<compile_context>
chip_gen: v5e
topology: v5e:2x2
jax: 0.10.0
libtpu: 0.0.40
codegen_flags: <defaults>
</compile_context>

<pallas_src>
import math
from functools import partial

import jax
import jax.numpy as jnp
from jax import lax
from jax.experimental import pallas as pl
from jax.experimental.pallas import tpu as pltpu


def _round_up(v, m):
    return ((v + m - 1) // m) * m


def _rbm_psi_kernel(xT_ref, w_ref, hb_ref, o_ref, *, h, h8):
    # xT: (N, TB) bf16; w: (Hp, N) f32; hb: (Hp, 1) f32; o: (1, TB) f32.
    xT = xT_ref[...].astype(jnp.float32)        # exact: x entries are +/-1
    w = w_ref[...]
    # z = W_aug @ x^T -> (Hp, TB): hidden units on sublanes, batch on lanes.
    # 'nn' contraction (K on lhs minor / rhs major) -> no in-kernel relayout.
    z = lax.dot_general(
        w, xT,
        dimension_numbers=(((1,), (0,)), ((), ())),
        preferred_element_type=jnp.float32)
    z = z + hb_ref[...]                          # bias (0 on vb / pad rows)

    zh = z[:h8, :]                               # hidden (+ a few pad) rows
    az = jnp.abs(zh)
    # log(2 cosh t) = |t| + log(1 + exp(-2|t|)); exp argument <= 0, so the
    # plain log form is numerically safe (argument in [1, 2]).
    log2cosh = az + jnp.log(1.0 + jnp.exp(-2.0 * az))
    logpsi = jnp.sum(log2cosh, axis=0, keepdims=True)   # (1, TB), lane-dense
    logpsi = logpsi + z[h8:h8 + 1, :]                    # + x @ visible_bias
    pad_rows = h8 - h
    if pad_rows:
        # zero-weight pad rows in [h, h8) each contributed log(2 cosh 0)=log 2
        logpsi = logpsi - (pad_rows * math.log(2.0))
    o_ref[...] = jnp.exp(logpsi)


def _vmem_budget_bytes():
    # Generation-aware budget for tile picking; conservative fallback.
    try:
        cap = pltpu.get_tpu_info().vmem_capacity_bytes
    except Exception:
        cap = 64 * 1024 * 1024                   # v7x per-TC capacity
    return min(cap // 4, 16 * 1024 * 1024)


def _pick_batch_tile(batch, n, hp, *, max_tile=8192):
    """Pick the batch tile TB (multiple of 128)."""
    # Per-batch-column VMEM footprint:
    #   2x double-buffered bf16 x column (n elems)            -> 2*n*2 bytes
    #   ~6 live (Hp, TB) f32 temps (z, |z|, exp, log, sum, ..)-> 6*hp*4 bytes
    #   double-buffered f32 output                            -> 2*4 bytes
    per_col = 2 * n * 2 + 6 * hp * 4 + 2 * 4
    budget = _vmem_budget_bytes()
    tile = (budget // max(per_col, 1)) // 128 * 128
    tile = max(128, min(max_tile, tile))
    b128 = _round_up(batch, 128)
    if b128 >= 2 * 128:
        # Keep >= 2 grid steps so "parallel" actually shards across v7x's
        # two TensorCores (and gives the pipeline something to overlap).
        tile = min(tile, max(128, (b128 // 2) // 128 * 128))
    tile = min(tile, b128)
    return tile


def _vmem_limit_bytes(tb, n, hp):
    x_tile = 2 * tb * n * 2          # double-buffered bf16 x tile
    temps = 6 * hp * tb * 4          # live (Hp, TB) f32 intermediates
    params = hp * n * 4 + hp * 4     # resident weights + bias
    out = 2 * tb * 4                 # double-buffered output row
    need = x_tile + temps + params + out + (1 << 20)
    # Track actual need; never request v7x's entire 64 MiB per-TC VMEM.
    return int(min(max(2 * need, 16 << 20), 48 << 20))


def prepare_rbm_params(weights, hidden_bias, visible_bias):
    """One-time (per parameter set) prep: augmented weight matrix + bias.

    Hoisted out of the per-call path so a sampling loop that evaluates psi
    many times per parameter update does not repeat the scatter/pad/cast ops.
    """
    H, N = weights.shape
    H8 = _round_up(max(H, 1), 8)          # sublane-aligned end of hidden rows
    Hp = _round_up(H8 + 1, 8)             # + visible-bias row, layout-padded
    w_aug = jnp.zeros((Hp, N), jnp.float32)
    w_aug = w_aug.at[:H, :].set(weights.astype(jnp.float32))
    w_aug = w_aug.at[H8, :].set(visible_bias.astype(jnp.float32))
    hb = jnp.zeros((Hp, 1), jnp.float32).at[:H, 0].set(
        hidden_bias.astype(jnp.float32))
    return {"w_aug": w_aug, "hb": hb, "H": H, "H8": H8, "N": N}


def rbm_psi(x, weights=None, hidden_bias=None, visible_bias=None, *, prep=None):
    """RBM 'real' wavefunction amplitude psi(x).

    x: (B, N) or (N,) spin configurations.  Either pass raw (weights (H,N),
    hidden_bias (H,), visible_bias (N,)) or a cached `prep` from
    prepare_rbm_params().  Returns psi with shape (B,).
    """
    if prep is None:
        prep = prepare_rbm_params(weights, hidden_bias, visible_bias)

    if x.ndim == 1:
        x = x.reshape(1, -1)
    B, N = x.shape
    assert N == prep["N"]
    w_aug, hb = prep["w_aug"], prep["hb"]
    H, H8 = prep["H"], prep["H8"]
    Hp = w_aug.shape[0]

    TB = _pick_batch_tile(B, N, Hp)
    B_pad = _round_up(B, TB)

    # Pre-transpose to (N, B) and cast to bf16 (exact for +/-1 spins): the
    # matmul becomes native 'nn', x HBM reads are lane-dense along batch, and
    # x DMA bytes / double-buffered VMEM footprint are halved.
    xT = jnp.asarray(x, jnp.float32).T.astype(jnp.bfloat16)
    if B_pad != B:
        # Edge-replicate so pad lanes evaluate a real sample (finite psi).
        xT = jnp.pad(xT, ((0, 0), (0, B_pad - B)), mode="edge")

    grid = (B_pad // TB,)

    # TODO(synk): if H or N ever exceeds a VMEM tile, add a second "arbitrary"
    # grid axis over hidden rows (K-blocks >= 256) with a (1, TB) log-psi
    # accumulator in scratch.
    out = pl.pallas_call(
        partial(_rbm_psi_kernel, h=H, h8=H8),
        out_shape=jax.ShapeDtypeStruct((1, B_pad), jnp.float32),
        grid_spec=pltpu.PrefetchScalarGridSpec(
            num_scalar_prefetch=0,
            grid=grid,
            in_specs=[
                pl.BlockSpec((N, TB), lambda i: (0, i)),   # x^T: streamed
                pl.BlockSpec((Hp, N), lambda i: (0, 0)),   # W_aug: resident
                pl.BlockSpec((Hp, 1), lambda i: (0, 0)),   # hidden bias
            ],
            out_specs=pl.BlockSpec((1, TB), lambda i: (0, i)),  # lane-dense psi
        ),
        compiler_params=pltpu.CompilerParams(
            dimension_semantics=("parallel",),
            vmem_limit_bytes=_vmem_limit_bytes(TB, N, Hp),
        ),
    )(xT, w_aug, hb)
    return out.reshape(B_pad)[:B]


def init_rbm_params(key, nqubits, alpha=1, iscale=0.001):
    """Deterministic parameter init mirroring RBMWavefunction.params_real."""
    num_hidden = int(alpha * nqubits)
    k_vb, k_hb, k_w = jax.random.split(key, 3)
    visible_bias = iscale * 100.0 * (
        jax.random.uniform(k_vb, (nqubits,), dtype=jnp.float32) - 0.5)
    hidden_bias = iscale * (
        jax.random.uniform(k_hb, (num_hidden,), dtype=jnp.float32) - 0.5)
    weights = iscale * (
        jax.random.uniform(k_w, (num_hidden, nqubits), dtype=jnp.float32) - 0.5)
    return weights, hidden_bias, visible_bias


# TODO(synk): rbm_type in ('complex', 'pRBM') needs complex arithmetic (no
# native complex support in Mosaic); 'cos'/'tanh' variants and the
# analytic_derivate (dlnPsi) path are not implemented here.

if __name__ == "__main__":
    nqubits = 16     # num_visible
    alpha = 2        # num_hidden = 32
    batch = 8

    key = jax.random.PRNGKey(0)
    k_params, k_x = jax.random.split(key)
    weights, hidden_bias, visible_bias = init_rbm_params(
        k_params, nqubits, alpha=alpha, iscale=0.001)

    # spin-like configurations in {-1, +1}
    x = (2.0 * jax.random.bernoulli(k_x, 0.5, (batch, nqubits)).astype(jnp.float32)
         - 1.0)

    # Parameter-side prep is done once per parameter set (sampling-loop hygiene).
    prep = prepare_rbm_params(weights, hidden_bias, visible_bias)

    psi = rbm_psi(x, prep=prep)
    psi = jax.block_until_ready(psi)

    # Reference in plain JAX (f32 params, same as the PyTorch module).
    theta = x @ weights.T + hidden_bias
    ref = jnp.exp(x @ visible_bias) * jnp.prod(2.0 * jnp.cosh(theta), axis=-1)

    assert psi.shape == (batch,)
    assert bool(jnp.allclose(psi, ref, rtol=2e-3, atol=1e-6)), (psi, ref)

    print("KERNEL_OK")
</pallas_src>

<mosaic_0001>
module attributes {stable_mosaic.version = 11 : i64} {
  func.func @_rbm_psi_kernel(%arg0: i32, %arg1: memref<16x128xbf16, #tpu.memory_space<vmem>>, %arg2: memref<40x16xf32, #tpu.memory_space<vmem>>, %arg3: memref<40x1xf32, #tpu.memory_space<vmem>>, %arg4: memref<1x128xf32, #tpu.memory_space<vmem>>) attributes {dimension_semantics = [#tpu.dimension_semantics<parallel>], iteration_bounds = array<i64: 1>, scalar_prefetch = 0 : i64, scratch_operands = 0 : i64, tpu.core_type = #tpu.core_type<tc>, window_params = [{transform_indices = @transform_0, window_bounds = array<i64: 16, 128>}, {pipeline_mode = #tpu.pipeline_mode<synchronous>, transform_indices = @transform_1, window_bounds = array<i64: 40, 16>}, {pipeline_mode = #tpu.pipeline_mode<synchronous>, transform_indices = @transform_2, window_bounds = array<i64: 40, 1>}, {transform_indices = @transform_3, window_bounds = array<i64: 1, 128>}]} {
    %c0 = arith.constant 0 : index
    %c0_0 = arith.constant 0 : index
    %0 = vector.load %arg1[%c0, %c0_0] : memref<16x128xbf16, #tpu.memory_space<vmem>>, vector<16x128xbf16>
    %1 = arith.extf %0 : vector<16x128xbf16> to vector<16x128xf32>
    %c0_1 = arith.constant 0 : index
    %c0_2 = arith.constant 0 : index
    %2 = vector.load %arg2[%c0_1, %c0_2] : memref<40x16xf32, #tpu.memory_space<vmem>>, vector<40x16xf32>
    %cst = arith.constant dense<0.000000e+00> : vector<40x128xf32>
    %3 = tpu.matmul %2, %1, %cst {dimension_numbers = #tpu.dot_dimension_numbers<[1], [0], [0], [1], [0, 0, 1, 1], [], []>} : vector<40x16xf32>, vector<16x128xf32>, vector<40x128xf32> -> vector<40x128xf32>
    %c0_3 = arith.constant 0 : index
    %c0_4 = arith.constant 0 : index
    %4 = vector.load %arg3[%c0_3, %c0_4] : memref<40x1xf32, #tpu.memory_space<vmem>>, vector<40x1xf32>
    %5 = vector.broadcast %4 : vector<40x1xf32> to vector<40x128xf32>
    %6 = arith.addf %3, %5 : vector<40x128xf32>
    %7 = vector.extract_strided_slice %6 {offsets = [0, 0], sizes = [32, 128], strides = [1, 1]} : vector<40x128xf32> to vector<32x128xf32>
    %8 = math.absf %7 : vector<32x128xf32>
    %cst_5 = arith.constant -2.000000e+00 : f32
    %9 = vector.broadcast %cst_5 : f32 to vector<32x128xf32>
    %10 = arith.mulf %9, %8 : vector<32x128xf32>
    %11 = math.exp %10 : vector<32x128xf32>
    %cst_6 = arith.constant 1.000000e+00 : f32
    %12 = vector.broadcast %cst_6 : f32 to vector<32x128xf32>
    %13 = arith.addf %12, %11 : vector<32x128xf32>
    %14 = math.log %13 : vector<32x128xf32>
    %15 = arith.addf %8, %14 : vector<32x128xf32>
    %cst_7 = arith.constant dense<0.000000e+00> : vector<128xf32>
    %16 = vector.multi_reduction <add>, %15, %cst_7 [0] : vector<32x128xf32> to vector<128xf32>
    %17 = vector.shape_cast %16 : vector<128xf32> to vector<1x128xf32>
    %18 = vector.extract_strided_slice %6 {offsets = [32, 0], sizes = [1, 128], strides = [1, 1]} : vector<40x128xf32> to vector<1x128xf32>
    %19 = arith.addf %17, %18 : vector<1x128xf32>
    %20 = math.exp %19 : vector<1x128xf32>
    %c0_8 = arith.constant 0 : index
    %c0_9 = arith.constant 0 : index
    %21 = vector.load %arg4[%c0_8, %c0_9] : memref<1x128xf32, #tpu.memory_space<vmem>>, vector<1x128xf32>
    tpu.vector_store %arg4[%c0_8, %c0_9], %20 {strides = array<i32>} : memref<1x128xf32, #tpu.memory_space<vmem>>, vector<1x128xf32>,
    return
  }
  func.func @transform_0(%arg0: i32) -> (i32, i32) {
    %c0_i32 = arith.constant 0 : i32
    %c0_i32_0 = arith.constant 0 : i32
    return %c0_i32, %arg0 : i32, i32
  }
  func.func @transform_1(%arg0: i32) -> (i32, i32) {
    %c0_i32 = arith.constant 0 : i32
    %c0_i32_0 = arith.constant 0 : i32
    %c0_i32_1 = arith.constant 0 : i32
    return %c0_i32, %c0_i32_0 : i32, i32
  }
  func.func @transform_2(%arg0: i32) -> (i32, i32) {
    %c0_i32 = arith.constant 0 : i32
    %c0_i32_0 = arith.constant 0 : i32
    %c0_i32_1 = arith.constant 0 : i32
    return %c0_i32, %c0_i32_0 : i32, i32
  }
  func.func @transform_3(%arg0: i32) -> (i32, i32) {
    %c0_i32 = arith.constant 0 : i32
    %c0_i32_0 = arith.constant 0 : i32
    return %c0_i32, %arg0 : i32, i32
  }
}

</mosaic_0001>

<bundles_post_ra>
// kernel: tpu_custom_call.1
= control target key start
LH: loop header
LB: loop body
LE: loop exit
PB: predicated region body
PF: predicated region fallthrough
CT: control target
= control target key end

     0   :  { %v227_v3 = vmov 0   ;;  %vm54_vm0 = vcmask 130048   ;;  %s290_s0 = inlined_call_operand.vmem [shape: bf16[16,128], index: 0, kind: input, shape index: {}]   ;;  %s291_s1 = inlined_call_operand.vmem [shape: f32[40,16], index: 1, kind: input, shape index: {}]   ;;  %s292_s2 = inlined_call_operand.vmem [shape: f32[40,1], index: 2, kind: input, shape index: {}]   ;;  %s293_s3 = inlined_call_operand.hbm [shape: f32[1,128], index: 3, kind: output, shape index: {}]  }
   0x1   :  { %v169_v0 = vld [vmem:[%s290_s0] sm:$0xff]   ;;  %180 = vset.pattern.permute.xlu0 %v227_v3  ;;  %181 = vset.pattern.permute.xlu1 %v227_v3  ;;  %v26_v5 = vld [vmem:[%s292_s2 + $0x10] sm:$0xff] }
   0x2   :  { %v171_v1 = vunpack.c.h.bf16 %v169_v0  ;;  %v170_v2 = vunpack.c.l.bf16 %v169_v0  ;;  %v24_v4 = vld [vmem:[%s292_s2] sm:$0xff]  ;;  %182 = vset.pattern.permute.xlu2 %v227_v3 }
   0x3   :  { %31 = vperm.xlu0 %180, %v24_v4   ;;  %v19_v6 = vld [vmem:[%s291_s1] sm:$0xff] }
   0x4   :  { %84 = vmatpush.msra.mxu0 %v171_v1  ;;  %172 = vmatpush.msra.mxu1 %v171_v1 }
   0x5   :  { %8 = vsyncpa [#allocation3], 0  ;;  %173 = vmatpush.msra.mxu2 %v171_v1  ;;  %v20_v7 = vld [vmem:[%s291_s1 + $0x8] sm:$0xff]  ;;  %v21_v8 = vld [vmem:[%s291_s1 + $0x10] sm:$0xff]  ;;  %41 = vperm.xlu1 %181, %v26_v5   ;;  %s154_s8 = sshll.u32 %s293_s3, 4  ;;  %s155_s8 = int_to_ptr.hbm [resolvable:$true] %s154_s8 }
   0x6   :  { %85 = vmatpush.msra.mxu0 %v170_v2  ;;  %175 = vmatpush.msra.mxu1 %v170_v2  ;;  %v28_v9 = vld [vmem:[%s292_s2 + $0x20] sm:$0xff]  ;;  %v25_v10 = vld [vmem:[%s292_s2 + $0x8] sm:$0xff]  ;;  %v27_v12 = vld [vmem:[%s292_s2 + $0x18] sm:$0xff] }
   0x7   :  { %176 = vmatpush.msra.mxu2 %v170_v2  ;;  %163 = vmatmul.msk.f32.vlgmr.msra.gmra.mxu0 %vm54_vm0, %v19_v6  ;;  %v23_v11 = vld [vmem:[%s291_s1 + $0x20] sm:$0xff]  ;;  %v22_v13 = vld [vmem:[%s291_s1 + $0x18] sm:$0xff]  ;;  %s228_s1 = smov [#allocation2]  }
   0x8   :  { %164 = vmatmul.msk.f32.vlgmr.msra.gmra.mxu1 %vm54_vm0, %v20_v7  ;;  %165 = vmatmul.msk.f32.vlgmr.msra.gmra.mxu2 %vm54_vm0, %v21_v8  ;;  %s152_s2 = sshll.u32 %s228_s1, 4  ;;  %s153_s2 = int_to_ptr.vmem [resolvable:$true] %s152_s2 }
   0x9   :  { %174 = vmatpush.msra.mxu3 %v171_v1  ;;  %51 = vperm.xlu2 %182, %v28_v9  }
   0xb   :  { %36 = vperm.xlu0 %180, %v25_v10   ;;  %177 = vmatpush.msra.mxu3 %v170_v2 }
   0xc   :  { %167 = vmatmul.msk.f32.vlgmr.msra.gmra.mxu3 %vm54_vm0, %v23_v11 }
   0xd   :  { %46 = vperm.xlu1 %181, %v27_v12  }
  0x10   :  { %166 = vmatmul.msk.f32.gmra.mxu2 %vm54_vm0, %v22_v13 }
  0x63   :  { %v52_v0 = vpop.permute.xlu2 %51 }
  0x75   :  { %v32_v14 = vpop.permute.xlu0 %31 }
  0x77   :  { %v42_v22 = vpop.permute.xlu1 %41 }
  0x7d   :  { %v37_v15 = vpop.permute.xlu0 %36 }
  0x7f   :  { %v47_v33 = vpop.permute.xlu1 %46 }
  0x84   :  { %v87_v16 = vpop.f32.mrf.mxu0 }
  0x85   :  { %v88_v17 = vadd.f32 %v87_v16, %v32_v14  ;;  %v90_v18 = vpop.f32.mrf.mxu1 }
  0x86   :  { %v91_v19 = vadd.f32 %v90_v18, %v37_v15 }
  0x87   :  { %v102_v20 = vand.u32 2147483647, %v88_v17 }
  0x88   :  { %v103_v21 = vand.u32 2147483647, %v91_v19 }
  0x89   :  { %v106_v23 = vmul.f32 -2.0, %v102_v20 }
  0x8a   :  { %v107_v24 = vmul.f32 -2.0, %v103_v21 }
  0x8b   :  { %v110_v25 = vmul.f32 1.442695, %v106_v23  ;;  %v93_v26 = vpop.f32.mrf.mxu2 }
  0x8c   :  { %v112_v27 = vmul.f32 1.442695, %v107_v24  ;;  %v94_v28 = vadd.f32 %v93_v26, %v42_v22 }
  0x8d   :  { %183 = vpow2.f32 %v110_v25 }
  0x8e   :  { %185 = vpow2.f32 %v112_v27  ;;  %v104_v29 = vand.u32 2147483647, %v94_v28 }
  0x8f   :  { %v99_v1 = vpop.f32.mrf.mxu3 }
  0x90   :  { %v108_v30 = vmul.f32 -2.0, %v104_v29  ;;  %v100_v3 = vadd.f32 %v99_v1, %v52_v0 }
  0x92   :  { %v114_v31 = vmul.f32 1.442695, %v108_v30 }
  0x93   :  { %v184_v32 = vpop.eup %183  ;;  %v96_v34 = vpop.f32.mrf.mxu2 }
  0x94   :  { %v186_v35 = vpop.eup %185  ;;  %187 = vpow2.f32 %v114_v31  ;;  %v97_v36 = vadd.f32 %v96_v34, %v47_v33  ;;  %v118_v37 = vadd.f32 1.0, %v184_v32 }
  0x95   :  { %v119_v39 = vadd.f32 1.0, %v186_v35 }
  0x96   :  { %v105_v38 = vand.u32 2147483647, %v97_v36  ;;  %189 = vlog2.f32 %v118_v37 }
  0x97   :  { %191 = vlog2.f32 %v119_v39 }
  0x98   :  { %v109_v40 = vmul.f32 -2.0, %v105_v38 }
  0x9a   :  { %v188_v41 = vpop.eup %187  ;;  %v116_v42 = vmul.f32 1.442695, %v109_v40 }
  0x9b   :  { %v120_v43 = vadd.f32 1.0, %v188_v41 }
  0x9c   :  { %193 = vpow2.f32 %v116_v42  ;;  %v190_v44 = vpop.eup %189 }
  0x9d   :  { %195 = vlog2.f32 %v120_v43  ;;  %v192_v45 = vpop.eup %191  ;;  %v123_v49 = vmul.f32 0.6931472, %v190_v44 }
  0x9e   :  { %v125_v50 = vmul.f32 0.6931472, %v192_v45 }
  0x9f   :  { %v130_v52 = vadd.f32 %v123_v49, %v102_v20 }
  0xa0   :  { %v131_v53 = vadd.f32 %v125_v50, %v103_v21 }
  0xa2   :  { %v194_v46 = vpop.eup %193  ;;  %v134_v56 = vadd.f32 %v131_v53, %v130_v52 }
  0xa3   :  { %v196_v47 = vpop.eup %195  ;;  %v121_v48 = vadd.f32 1.0, %v194_v46 }
  0xa4   :  { %v127_v51 = vmul.f32 0.6931472, %v196_v47 }
  0xa5   :  { %197 = vlog2.f32 %v121_v48 }
  0xa6   :  { %v132_v54 = vadd.f32 %v127_v51, %v104_v29 }
  0xa8   :  { %v135_v58 = vadd.f32 %v134_v56, %v132_v54 }
  0xab   :  { %v198_v55 = vpop.eup %197 }
  0xac   :  { %v129_v57 = vmul.f32 0.6931472, %v198_v55 }
  0xae   :  { %v133_v59 = vadd.f32 %v129_v57, %v105_v38 }
  0xb0   :  { %v136_v60 = vadd.f32 %v135_v58, %v133_v59 }
  0xb2   :  { %v137_v61 = vrot.slane %v136_v60, 4 }
  0xb4   :  { %v138_v62 = vadd.f32 %v137_v61, %v136_v60 }
  0xb6   :  { %v139_v63 = vrot.slane %v138_v62, 2 }
  0xb8   :  { %v140_v2 = vadd.f32 %v139_v63, %v138_v62 }
  0xba   :  { %v141_v4 = vrot.slane %v140_v2, 1 }
  0xbc   :  { %v142_v5 = vadd.f32 %v141_v4, %v140_v2 }
  0xbe   :  { %v143_v6 = vadd.f32 %v142_v5, %v100_v3 }
  0xc0   :  { %v144_v7 = vmul.f32 1.442695, %v143_v6 }
  0xc2   :  { %199 = vpow2.f32 %v144_v7 }
  0xc8   :  { %v200_v8 = vpop.eup %199 }
  0xc9   :  { %146 = vst [vmem:[#allocation2] sm:$0x1] %v200_v8 }
  0xca   :  { %157 = dma.vmem_to_hbm [thread:$0]  %s153_s2, 16, %s155_s8, [#allocation3]  }
  0xcb   :  { %225 = dma.done.wait [#allocation3], 16  }
  0xcc   :  { %226 = vsyncadd [#allocation3], 4294967280 }
  0xcd   :  { %162 = vsyncpa [#allocation3], 1 }

</bundles_post_ra>
